<compile_context>
chip_gen: v7x
topology: tpu7x:2x2x1
jax: 0.10.0
libtpu: 0.0.40
codegen_flags: <defaults>
</compile_context>

<pallas_src>
import functools

import numpy as np

import jax
import jax.numpy as jnp
from jax.experimental import pallas as pl
from jax.experimental.pallas import tpu as pltpu  # noqa: F401  (TPU backend)

EPS = 1e-5     # nn.LayerNorm default eps
LANE = 128     # lane-dense padding width for the output / slab


# --------------------------------- kernel ---------------------------------
def dad_kernel(x_ref, y_ref, slab_ref, out_ref, *, D, E, H, B, tB, offs):
    H2, E2 = 2 * H, 2 * E

    def blk(name, r, c):                       # static slab slice: (r, c) matrix
        o = offs[name]
        return slab_ref[o:o + r, :c]

    def row(name, c):                          # static slab slice: (1, c) row
        o = offs[name]
        return slab_ref[o:o + 1, :c]

    dot = functools.partial(jnp.dot, preferred_element_type=jnp.float32)

    x = x_ref[...]                             # (t*B, D)
    y = y_ref[...]                             # (t*B, 1)

    # ---- encoder: Linear -> LayerNorm -> ReLU (weights pre-centered, so the
    # matmul yields z - mean(z); variance is a lane reduce, not a matmul) ----
    d0 = dot(x, blk("w_enc", D, E)) + row("b_enc", E)
    v0 = jnp.mean(d0 * d0, axis=-1, keepdims=True)
    enc = jnp.maximum(
        d0 * jax.lax.rsqrt(v0 + EPS) * row("g_enc", E) + row("be_enc", E), 0.0)

    # ---- fused heads layer 1: E -> 2H (head0 | head1), per-half LayerNorm ----
    d1 = dot(enc, blk("w1", E, H2)) + row("b1", H2)
    v1 = dot(d1 * d1, blk("p2h", H2, H2))          # per-half biased variance
    h1 = jnp.maximum(
        d1 * jax.lax.rsqrt(v1 + EPS) * row("g1", H2) + row("be1", H2), 0.0)

    # ---- fused heads layer 2 (block-diagonal): 2H -> 2E, per-half LayerNorm ----
    d2 = dot(h1, blk("w2", H2, E2)) + row("b2", E2)
    v2 = dot(d2 * d2, blk("p2e", E2, E2))
    h2 = jnp.maximum(
        d2 * jax.lax.rsqrt(v2 + EPS) * row("g2", E2) + row("be2", E2), 0.0)

    # ---- outcome gating y*head1 + (1-y)*head0 (precomputed mask rows), then
    # sum over the t axis via the precomputed selection matrix ----
    gate = row("c0", E2) + y * row("c1", E2)       # (t*B, 2E)
    acc = dot(blk("smat", B, tB), h2 * gate)       # (B, 2E)

    # ---- half-fold + time projection (time-embedding folded into bias) +
    # decoder Linear1, all folded into one (2E, H) weight; ReLU; decoder
    # Linear2 lane-padded to 128 ----
    hd = jnp.maximum(dot(acc, blk("w_pd", E2, H)) + row("b_pd", H), 0.0)
    out = dot(hd, blk("w_dec2", H, LANE)) + row("b_dec2", LANE)
    out_ref[...] = out.astype(out_ref.dtype)


# --------------------------- parameter packing ------------------------------
def _block_avg(width, block):
    """(width, width) matrix averaging each contiguous `block`-wide group."""
    r = np.arange(width)[:, None] // block
    c = np.arange(width)[None, :] // block
    return (r == c).astype(np.float64) / float(block)


def pack_params(p, D, E, H, B, t):
    """One-time prep (all host-side numpy, exact): fuse the two heads, center
    every LayerNorm-feeding Linear with (I - P), fold half-sum + time
    projection + decoder Linear1, pad the decoder output to 128 lanes, and
    pack everything (weights, constants, bias/gamma/beta rows) into one
    zero-padded (R, 128) f32 slab at 8-aligned row offsets."""
    H2, E2 = 2 * H, 2 * E
    assert max(E, H2, E2) <= LANE
    f = lambda a: np.asarray(a, np.float64)

    # encoder: pre-centered Linear (LN mean folded into the weight/bias)
    C_E = np.eye(E) - _block_avg(E, E)
    w_enc = f(p["enc_w"]) @ C_E
    b_enc = f(p["enc_b"]) @ C_E

    # fused heads layer 1 (E, 2H), centered per half
    C_2H = np.eye(H2) - _block_avg(H2, H)
    w1 = np.concatenate([f(p["h0_w1"]), f(p["h1_w1"])], axis=1) @ C_2H
    b1 = np.concatenate([f(p["h0_b1"]), f(p["h1_b1"])], axis=1) @ C_2H
    g1 = np.concatenate([f(p["h0_g1"]), f(p["h1_g1"])], axis=1)
    be1 = np.concatenate([f(p["h0_be1"]), f(p["h1_be1"])], axis=1)

    # block-diagonal heads layer 2 (2H, 2E), centered per half
    C_2E = np.eye(E2) - _block_avg(E2, E)
    w2 = np.zeros((H2, E2))
    w2[:H, :E] = f(p["h0_w2"])
    w2[H:, E:] = f(p["h1_w2"])
    w2 = w2 @ C_2E
    b2 = np.concatenate([f(p["h0_b2"]), f(p["h1_b2"])], axis=1) @ C_2E
    g2 = np.concatenate([f(p["h0_g2"]), f(p["h1_g2"])], axis=1)
    be2 = np.concatenate([f(p["h0_be2"]), f(p["h1_be2"])], axis=1)

    # constant matrices: per-half variance averaging, t-sum selection
    P_2H = _block_avg(H2, H)
    P_2E = _block_avg(E2, E)
    s_mat = (np.arange(t * B)[None, :] % B == np.arange(B)[:, None]).astype(np.float64)

    # outcome-gate rows: gate = c0 + y * c1 (lane >= E selects head1)
    m = (np.arange(E2) >= E).astype(np.float64)[None, :]
    c0 = 1.0 - m
    c1 = 2.0 * m - 1.0

    # half-fold + time projection (embedding term -> bias) + decoder Linear1
    tp_b_eff = f(p["te"]) @ f(p["tp_wt"]) + f(p["tp_b"])                     # (1, E)
    w_pd = np.concatenate([f(p["tp_wx"]), f(p["tp_wx"])], axis=0) @ f(p["dec_w1"])  # (2E, H)
    b_pd = tp_b_eff @ f(p["dec_w1"]) + f(p["dec_b1"])                        # (1, H)

    # lane-dense decoder output layer
    w_dec2 = np.zeros((H, LANE))
    w_dec2[:, :D] = f(p["dec_w2"])
    b_dec2 = np.zeros((1, LANE))
    b_dec2[:, :D] = f(p["dec_b2"])

    blocks = [
        ("w_enc", w_enc), ("w1", w1), ("p2h", P_2H), ("w2", w2),
        ("p2e", P_2E), ("smat", s_mat), ("w_pd", w_pd), ("w_dec2", w_dec2),
        ("b_enc", b_enc), ("g_enc", f(p["enc_g"])), ("be_enc", f(p["enc_be"])),
        ("b1", b1), ("g1", g1), ("be1", be1),
        ("b2", b2), ("g2", g2), ("be2", be2),
        ("c0", c0), ("c1", c1), ("b_pd", b_pd), ("b_dec2", b_dec2),
    ]
    offs, chunks, cur = {}, [], 0
    for name, a in blocks:
        r, c = a.shape
        offs[name] = cur
        pad_r = -(-r // 8) * 8                       # 8-aligned row extents
        buf = np.zeros((pad_r, LANE))
        buf[:r, :c] = a
        chunks.append(buf)
        cur += pad_r
    slab = np.concatenate(chunks, axis=0).astype(np.float32)
    return jnp.asarray(slab), offs


# -------------------------------- wrapper ----------------------------------
def deep_adaptive_design(designs, outcomes, slab, offs, *, E, H):
    t, B, D = designs.shape
    tB = t * B
    x = designs.reshape(tB, D)        # time-major flatten: row j = i*B + b
    y = outcomes.reshape(tB, 1)

    kernel = functools.partial(dad_kernel, D=D, E=E, H=H, B=B, tB=tB, offs=offs)

    out_padded = pl.pallas_call(
        kernel,
        out_shape=jax.ShapeDtypeStruct((B, LANE), jnp.float32),
        in_specs=[
            pl.BlockSpec((tB, D), lambda *_: (0, 0)),
            pl.BlockSpec((tB, 1), lambda *_: (0, 0)),
            pl.BlockSpec(slab.shape, lambda *_: (0, 0)),
        ],
        out_specs=pl.BlockSpec((B, LANE), lambda *_: (0, 0)),
    )(x, y, slab)
    return out_padded[:, :D]


# ------------------------- deterministic parameters -------------------------
def init_params(key, D, T, E, H, t_steps):
    """Mirror torch defaults: Linear ~ U(+-1/sqrt(fan_in)) for w and b,
    LayerNorm gamma=1/beta=0, time_embeddings ~ U(0,1).  Returned as numpy."""
    ks = iter(jax.random.split(key, 32))

    def lin(fan_in, fan_out):
        bound = 1.0 / (fan_in ** 0.5)
        w = jax.random.uniform(next(ks), (fan_in, fan_out), jnp.float32, -bound, bound)
        b = jax.random.uniform(next(ks), (1, fan_out), jnp.float32, -bound, bound)
        return np.asarray(w, np.float32), np.asarray(b, np.float32)

    def ln(dim):
        return np.ones((1, dim), np.float32), np.zeros((1, dim), np.float32)

    p = {}
    p["enc_w"], p["enc_b"] = lin(D, E)
    p["enc_g"], p["enc_be"] = ln(E)

    for h in ("h0", "h1"):
        p[f"{h}_w1"], p[f"{h}_b1"] = lin(E, H)
        p[f"{h}_g1"], p[f"{h}_be1"] = ln(H)
        p[f"{h}_w2"], p[f"{h}_b2"] = lin(H, E)
        p[f"{h}_g2"], p[f"{h}_be2"] = ln(E)

    # time embeddings ~ torch.rand(T, E); forward indexes row t = designs.shape[0]
    time_embeddings = np.asarray(jax.random.uniform(next(ks), (T, E), jnp.float32))
    p["te"] = time_embeddings[t_steps][None, :]                      # (1, E)

    bnd = 1.0 / ((2 * E) ** 0.5)
    tp_w_full = np.asarray(
        jax.random.uniform(next(ks), (2 * E, E), jnp.float32, -bnd, bnd))
    p["tp_w_full"] = tp_w_full
    p["tp_wx"] = tp_w_full[:E]
    p["tp_wt"] = tp_w_full[E:]
    p["tp_b"] = np.asarray(
        jax.random.uniform(next(ks), (1, E), jnp.float32, -bnd, bnd))

    p["dec_w1"], p["dec_b1"] = lin(E, H)
    p["dec_w2"], p["dec_b2"] = lin(H, D)
    return p


# ------------------------------ numpy reference ------------------------------
def reference(designs, outcomes, p):
    """Straight transcription of the PyTorch forward (float64, exact)."""
    designs = designs.astype(np.float64)
    outcomes = outcomes.astype(np.float64)
    relu = lambda v: np.maximum(v, 0.0)

    def lnorm(x, g, b):
        mu = x.mean(-1, keepdims=True)
        var = ((x - mu) ** 2).mean(-1, keepdims=True)
        return (x - mu) / np.sqrt(var + EPS) * g + b

    enc = relu(lnorm(designs @ p["enc_w"] + p["enc_b"], p["enc_g"], p["enc_be"]))

    def head(x, h):
        z = relu(lnorm(x @ p[f"{h}_w1"] + p[f"{h}_b1"], p[f"{h}_g1"], p[f"{h}_be1"]))
        return relu(lnorm(z @ p[f"{h}_w2"] + p[f"{h}_b2"], p[f"{h}_g2"], p[f"{h}_be2"]))

    x0, x1 = head(enc, "h0"), head(enc, "h1")
    x = (outcomes * x1 + (1.0 - outcomes) * x0).sum(axis=0)          # (B, E)
    te = np.broadcast_to(p["te"], x.shape)
    x = np.concatenate([x, te], axis=-1) @ p["tp_w_full"] + p["tp_b"]
    h = relu(x @ p["dec_w1"] + p["dec_b1"])
    return h @ p["dec_w2"] + p["dec_b2"]


# ----------------------------------- main -----------------------------------
if __name__ == "__main__":
    D = 4        # design_shape
    T = 8        # total experiment budget
    E = 16       # embedding_dim
    H = 32       # hidden_dim
    B = 2        # batch
    t_steps = 3  # history length (t < T)

    root = jax.random.PRNGKey(0)
    k_d, k_o, k_p = jax.random.split(root, 3)

    designs = jax.random.normal(k_d, (t_steps, B, D), jnp.float32)
    outcomes = jax.random.bernoulli(k_o, 0.5, (t_steps, B, 1)).astype(jnp.float32)

    params = init_params(k_p, D, T, E, H, t_steps)
    slab, offs = pack_params(params, D, E, H, B, t_steps)   # one-time prep

    out = deep_adaptive_design(designs, outcomes, slab, offs, E=E, H=H)
    out = jax.block_until_ready(out)

    ref = reference(np.asarray(designs), np.asarray(outcomes), params)
    assert out.shape == (B, D)
    # Tolerance accounts for pack-time weight re-association and MXU f32 pass
    # behavior; logic bugs would produce errors orders of magnitude larger.
    assert np.allclose(np.asarray(out), ref.astype(np.float32),
                       atol=2e-3, rtol=2e-3), (np.asarray(out), ref)

    print("KERNEL_OK")
</pallas_src>

<mosaic_0001>
module attributes {stable_mosaic.version = 11 : i64} {
  func.func @dad_kernel(%arg0: memref<6x4xf32, #tpu.memory_space<vmem>>, %arg1: memref<6x1xf32, #tpu.memory_space<vmem>>, %arg2: memref<360x128xf32, #tpu.memory_space<vmem>>, %arg3: memref<2x128xf32, #tpu.memory_space<vmem>>) attributes {dimension_semantics = [], scalar_prefetch = 0 : i64, scratch_operands = 0 : i64, tpu.core_type = #tpu.core_type<tc>} {
    %c0 = arith.constant 0 : index
    %c0_0 = arith.constant 0 : index
    %0 = vector.load %arg0[%c0, %c0_0] : memref<6x4xf32, #tpu.memory_space<vmem>>, vector<6x4xf32>
    %c0_1 = arith.constant 0 : index
    %c0_2 = arith.constant 0 : index
    %1 = vector.load %arg1[%c0_1, %c0_2] : memref<6x1xf32, #tpu.memory_space<vmem>>, vector<6x1xf32>
    %c0_3 = arith.constant 0 : index
    %c0_4 = arith.constant 0 : index
    %2 = vector.load %arg2[%c0_3, %c0_4] : memref<360x128xf32, #tpu.memory_space<vmem>>, vector<4x16xf32>
    %cst = arith.constant dense<0.000000e+00> : vector<6x16xf32>
    %3 = tpu.matmul %0, %2, %cst {dimension_numbers = #tpu.dot_dimension_numbers<[1], [0], [0], [1], [0, 0, 1, 1], [], []>} : vector<6x4xf32>, vector<4x16xf32>, vector<6x16xf32> -> vector<6x16xf32>
    %c256 = arith.constant 256 : index
    %c0_5 = arith.constant 0 : index
    %4 = vector.load %arg2[%c256, %c0_5] : memref<360x128xf32, #tpu.memory_space<vmem>>, vector<1x16xf32>
    %5 = vector.broadcast %4 : vector<1x16xf32> to vector<6x16xf32>
    %6 = arith.addf %3, %5 : vector<6x16xf32>
    %7 = arith.mulf %6, %6 : vector<6x16xf32>
    %cst_6 = arith.constant dense<0.000000e+00> : vector<6xf32>
    %8 = vector.multi_reduction <add>, %7, %cst_6 [1] : vector<6x16xf32> to vector<6xf32>
    %9 = vector.shape_cast %8 : vector<6xf32> to vector<6x1xf32>
    %cst_7 = arith.constant 1.600000e+01 : f32
    %10 = vector.broadcast %cst_7 : f32 to vector<6x1xf32>
    %11 = arith.divf %9, %10 : vector<6x1xf32>
    %cst_8 = arith.constant 9.99999974E-6 : f32
    %12 = vector.broadcast %cst_8 : f32 to vector<6x1xf32>
    %13 = arith.addf %11, %12 : vector<6x1xf32>
    %14 = math.rsqrt %13 : vector<6x1xf32>
    %15 = vector.broadcast %14 : vector<6x1xf32> to vector<6x16xf32>
    %16 = arith.mulf %6, %15 : vector<6x16xf32>
    %c264 = arith.constant 264 : index
    %c0_9 = arith.constant 0 : index
    %17 = vector.load %arg2[%c264, %c0_9] : memref<360x128xf32, #tpu.memory_space<vmem>>, vector<1x16xf32>
    %18 = vector.broadcast %17 : vector<1x16xf32> to vector<6x16xf32>
    %19 = arith.mulf %16, %18 : vector<6x16xf32>
    %c272 = arith.constant 272 : index
    %c0_10 = arith.constant 0 : index
    %20 = vector.load %arg2[%c272, %c0_10] : memref<360x128xf32, #tpu.memory_space<vmem>>, vector<1x16xf32>
    %21 = vector.broadcast %20 : vector<1x16xf32> to vector<6x16xf32>
    %22 = arith.addf %19, %21 : vector<6x16xf32>
    %cst_11 = arith.constant 0.000000e+00 : f32
    %23 = vector.broadcast %cst_11 : f32 to vector<6x16xf32>
    %24 = arith.maximumf %22, %23 : vector<6x16xf32>
    %c8 = arith.constant 8 : index
    %c0_12 = arith.constant 0 : index
    %25 = vector.load %arg2[%c8, %c0_12] : memref<360x128xf32, #tpu.memory_space<vmem>>, vector<16x64xf32>
    %cst_13 = arith.constant dense<0.000000e+00> : vector<6x64xf32>
    %26 = tpu.matmul %24, %25, %cst_13 {dimension_numbers = #tpu.dot_dimension_numbers<[1], [0], [0], [1], [0, 0, 1, 1], [], []>} : vector<6x16xf32>, vector<16x64xf32>, vector<6x64xf32> -> vector<6x64xf32>
    %c280 = arith.constant 280 : index
    %c0_14 = arith.constant 0 : index
    %27 = vector.load %arg2[%c280, %c0_14] : memref<360x128xf32, #tpu.memory_space<vmem>>, vector<1x64xf32>
    %28 = vector.broadcast %27 : vector<1x64xf32> to vector<6x64xf32>
    %29 = arith.addf %26, %28 : vector<6x64xf32>
    %30 = arith.mulf %29, %29 : vector<6x64xf32>
    %c24 = arith.constant 24 : index
    %c0_15 = arith.constant 0 : index
    %31 = vector.load %arg2[%c24, %c0_15] : memref<360x128xf32, #tpu.memory_space<vmem>>, vector<64x64xf32>
    %cst_16 = arith.constant dense<0.000000e+00> : vector<6x64xf32>
    %32 = tpu.matmul %30, %31, %cst_16 {dimension_numbers = #tpu.dot_dimension_numbers<[1], [0], [0], [1], [0, 0, 1, 1], [], []>} : vector<6x64xf32>, vector<64x64xf32>, vector<6x64xf32> -> vector<6x64xf32>
    %cst_17 = arith.constant 9.99999974E-6 : f32
    %33 = vector.broadcast %cst_17 : f32 to vector<6x64xf32>
    %34 = arith.addf %32, %33 : vector<6x64xf32>
    %35 = math.rsqrt %34 : vector<6x64xf32>
    %36 = arith.mulf %29, %35 : vector<6x64xf32>
    %c288 = arith.constant 288 : index
    %c0_18 = arith.constant 0 : index
    %37 = vector.load %arg2[%c288, %c0_18] : memref<360x128xf32, #tpu.memory_space<vmem>>, vector<1x64xf32>
    %38 = vector.broadcast %37 : vector<1x64xf32> to vector<6x64xf32>
    %39 = arith.mulf %36, %38 : vector<6x64xf32>
    %c296 = arith.constant 296 : index
    %c0_19 = arith.constant 0 : index
    %40 = vector.load %arg2[%c296, %c0_19] : memref<360x128xf32, #tpu.memory_space<vmem>>, vector<1x64xf32>
    %41 = vector.broadcast %40 : vector<1x64xf32> to vector<6x64xf32>
    %42 = arith.addf %39, %41 : vector<6x64xf32>
    %cst_20 = arith.constant 0.000000e+00 : f32
    %43 = vector.broadcast %cst_20 : f32 to vector<6x64xf32>
    %44 = arith.maximumf %42, %43 : vector<6x64xf32>
    %c88 = arith.constant 88 : index
    %c0_21 = arith.constant 0 : index
    %45 = vector.load %arg2[%c88, %c0_21] : memref<360x128xf32, #tpu.memory_space<vmem>>, vector<64x32xf32>
    %cst_22 = arith.constant dense<0.000000e+00> : vector<6x32xf32>
    %46 = tpu.matmul %44, %45, %cst_22 {dimension_numbers = #tpu.dot_dimension_numbers<[1], [0], [0], [1], [0, 0, 1, 1], [], []>} : vector<6x64xf32>, vector<64x32xf32>, vector<6x32xf32> -> vector<6x32xf32>
    %c304 = arith.constant 304 : index
    %c0_23 = arith.constant 0 : index
    %47 = vector.load %arg2[%c304, %c0_23] : memref<360x128xf32, #tpu.memory_space<vmem>>, vector<1x32xf32>
    %48 = vector.broadcast %47 : vector<1x32xf32> to vector<6x32xf32>
    %49 = arith.addf %46, %48 : vector<6x32xf32>
    %50 = arith.mulf %49, %49 : vector<6x32xf32>
    %c152 = arith.constant 152 : index
    %c0_24 = arith.constant 0 : index
    %51 = vector.load %arg2[%c152, %c0_24] : memref<360x128xf32, #tpu.memory_space<vmem>>, vector<32x32xf32>
    %cst_25 = arith.constant dense<0.000000e+00> : vector<6x32xf32>
    %52 = tpu.matmul %50, %51, %cst_25 {dimension_numbers = #tpu.dot_dimension_numbers<[1], [0], [0], [1], [0, 0, 1, 1], [], []>} : vector<6x32xf32>, vector<32x32xf32>, vector<6x32xf32> -> vector<6x32xf32>
    %cst_26 = arith.constant 9.99999974E-6 : f32
    %53 = vector.broadcast %cst_26 : f32 to vector<6x32xf32>
    %54 = arith.addf %52, %53 : vector<6x32xf32>
    %55 = math.rsqrt %54 : vector<6x32xf32>
    %56 = arith.mulf %49, %55 : vector<6x32xf32>
    %c312 = arith.constant 312 : index
    %c0_27 = arith.constant 0 : index
    %57 = vector.load %arg2[%c312, %c0_27] : memref<360x128xf32, #tpu.memory_space<vmem>>, vector<1x32xf32>
    %58 = vector.broadcast %57 : vector<1x32xf32> to vector<6x32xf32>
    %59 = arith.mulf %56, %58 : vector<6x32xf32>
    %c320 = arith.constant 320 : index
    %c0_28 = arith.constant 0 : index
    %60 = vector.load %arg2[%c320, %c0_28] : memref<360x128xf32, #tpu.memory_space<vmem>>, vector<1x32xf32>
    %61 = vector.broadcast %60 : vector<1x32xf32> to vector<6x32xf32>
    %62 = arith.addf %59, %61 : vector<6x32xf32>
    %cst_29 = arith.constant 0.000000e+00 : f32
    %63 = vector.broadcast %cst_29 : f32 to vector<6x32xf32>
    %64 = arith.maximumf %62, %63 : vector<6x32xf32>
    %c328 = arith.constant 328 : index
    %c0_30 = arith.constant 0 : index
    %65 = vector.load %arg2[%c328, %c0_30] : memref<360x128xf32, #tpu.memory_space<vmem>>, vector<1x32xf32>
    %c336 = arith.constant 336 : index
    %c0_31 = arith.constant 0 : index
    %66 = vector.load %arg2[%c336, %c0_31] : memref<360x128xf32, #tpu.memory_space<vmem>>, vector<1x32xf32>
    %67 = vector.broadcast %1 : vector<6x1xf32> to vector<6x32xf32>
    %68 = vector.broadcast %66 : vector<1x32xf32> to vector<6x32xf32>
    %69 = arith.mulf %67, %68 : vector<6x32xf32>
    %70 = vector.broadcast %65 : vector<1x32xf32> to vector<6x32xf32>
    %71 = arith.addf %70, %69 : vector<6x32xf32>
    %c184 = arith.constant 184 : index
    %c0_32 = arith.constant 0 : index
    %72 = vector.load %arg2[%c184, %c0_32] : memref<360x128xf32, #tpu.memory_space<vmem>>, vector<2x6xf32>
    %73 = arith.mulf %64, %71 : vector<6x32xf32>
    %cst_33 = arith.constant dense<0.000000e+00> : vector<2x32xf32>
    %74 = tpu.matmul %72, %73, %cst_33 {dimension_numbers = #tpu.dot_dimension_numbers<[1], [0], [0], [1], [0, 0, 1, 1], [], []>} : vector<2x6xf32>, vector<6x32xf32>, vector<2x32xf32> -> vector<2x32xf32>
    %c192 = arith.constant 192 : index
    %c0_34 = arith.constant 0 : index
    %75 = vector.load %arg2[%c192, %c0_34] : memref<360x128xf32, #tpu.memory_space<vmem>>, vector<32x32xf32>
    %cst_35 = arith.constant dense<0.000000e+00> : vector<2x32xf32>
    %76 = tpu.matmul %74, %75, %cst_35 {dimension_numbers = #tpu.dot_dimension_numbers<[1], [0], [0], [1], [0, 0, 1, 1], [], []>} : vector<2x32xf32>, vector<32x32xf32>, vector<2x32xf32> -> vector<2x32xf32>
    %c344 = arith.constant 344 : index
    %c0_36 = arith.constant 0 : index
    %77 = vector.load %arg2[%c344, %c0_36] : memref<360x128xf32, #tpu.memory_space<vmem>>, vector<1x32xf32>
    %78 = vector.broadcast %77 : vector<1x32xf32> to vector<2x32xf32>
    %79 = arith.addf %76, %78 : vector<2x32xf32>
    %cst_37 = arith.constant 0.000000e+00 : f32
    %80 = vector.broadcast %cst_37 : f32 to vector<2x32xf32>
    %81 = arith.maximumf %79, %80 : vector<2x32xf32>
    %c224 = arith.constant 224 : index
    %c0_38 = arith.constant 0 : index
    %82 = vector.load %arg2[%c224, %c0_38] : memref<360x128xf32, #tpu.memory_space<vmem>>, vector<32x128xf32>
    %cst_39 = arith.constant dense<0.000000e+00> : vector<2x128xf32>
    %83 = tpu.matmul %81, %82, %cst_39 {dimension_numbers = #tpu.dot_dimension_numbers<[1], [0], [0], [1], [0, 0, 1, 1], [], []>} : vector<2x32xf32>, vector<32x128xf32>, vector<2x128xf32> -> vector<2x128xf32>
    %c352 = arith.constant 352 : index
    %c0_40 = arith.constant 0 : index
    %84 = vector.load %arg2[%c352, %c0_40] : memref<360x128xf32, #tpu.memory_space<vmem>>, vector<1x128xf32>
    %85 = vector.broadcast %84 : vector<1x128xf32> to vector<2x128xf32>
    %86 = arith.addf %83, %85 : vector<2x128xf32>
    %c0_41 = arith.constant 0 : index
    %c0_42 = arith.constant 0 : index
    %87 = vector.load %arg3[%c0_41, %c0_42] : memref<2x128xf32, #tpu.memory_space<vmem>>, vector<2x128xf32>
    tpu.vector_store %arg3[%c0_41, %c0_42], %86 {strides = array<i32>} : memref<2x128xf32, #tpu.memory_space<vmem>>, vector<2x128xf32>,
    return
  }
}

</mosaic_0001>

<bundles_post_ra>
// kernel: tpu_custom_call.1
= control target key start
LH: loop header
LB: loop body
LE: loop exit
PB: predicated region body
PF: predicated region fallthrough
CT: control target
= control target key end

     0   :  { %8 = vsyncpa [#allocation3], 0  ;;  %s1130_s0 = inlined_call_operand.vmem [shape: f32[6,4], index: 0, kind: input, shape index: {}]   ;;  %s1131_s1 = inlined_call_operand.vmem [shape: f32[6,1], index: 1, kind: input, shape index: {}]   ;;  %s1132_s2 = inlined_call_operand.hbm [shape: f32[360,128], index: 2, kind: input, shape index: {}]   ;;  %s1133_s3 = inlined_call_operand.hbm [shape: f32[2,128], index: 3, kind: output, shape index: {}]  }
   0x1   :  { %9 = vsyncpa [#allocation4], 0  ;;  %s1034_s12 = smov [#allocation2]   ;;  %s986_s16 = scalar_lea.hbm %s1132_s2, 5760 }
   0x2   :  { %s19_s13 = sshll.u32 %s1034_s12, 4  ;;  %p987_p0 = scmp.ne.s32.totalorder %s1132_s2, %s986_s16  ;;  %s20_s13 = int_to_ptr.vmem [resolvable:$true] %s19_s13 }
   0x3   :  { %p990_p1 = scmp.lt.u32.totalorder %s986_s16, %s1132_s2 }
   0x5   :  { %p992_p2 = pnand %p990_p1, %p987_p0 }
   0x7   :  { %995 = shalt.err (!%p992_p2)
}
   0x8   :  { %s996_s21 = scalar_lea.vmem %s20_s13, 5760  ;;  %p1001_p4 = scmp.lt.s32.totalorder %s20_s13, %s20_s13 }
   0x9   :  { %p997_p3 = scmp.ne.s32.totalorder %s20_s13, %s996_s21  ;;  %p1002_p5 = scmp.lt.s32.totalorder %s996_s21, %s996_s21 }
   0xb   :  { %p1003_p6 = por %p1002_p5, %p1001_p4 }
   0xd   :  { %p1004_p7 = pnand %p1003_p6, %p997_p3 }
   0xf   :  { %1007 = shalt.err (!%p1004_p7)
}
  0x10   :  { %s1035_s22 = smov 128   ;;  %s1036_s23 = smov 8  }
  0x11   :  { %25 = dma.hbm_to_vmem [thread:$0]  %s1132_s2, 5760, %s20_s13, [#allocation3], %s1035_s22, %s1035_s22, %s1036_s23  }
  0x12   :  { %1030 = dma.done.wait [#allocation3], 5760  }
  0x13   :  { %1031 = vsyncadd [#allocation3], 4294961536  ;;  %v1037_v0 = vmov 0.0   ;;  %vm1038_vm0 = vmmov 0   ;;  %vm41_vm1 = vcmask 1043456   ;;  %vm37_vm2 = vcmask 31744  }
  0x14   :  { %838 = vmatprep.subr.mxu0 %v1037_v0  ;;  %840 = vmatprep.mubr.msk.f32.mxu0 %vm1038_vm0, %v1037_v0  ;;  %v31_v1 = vld [vmem:[#allocation2] sm:$0xf]  ;;  %vm116_vm3 = vcmask 128000   ;;  %v138_v9 = vld [vmem:[#allocation2 + $0x8] sm:$0xff]  ;;  %v139_v10 = vld [vmem:[#allocation2 + $0x10] sm:$0xff]  ;;  %v1039_v11 = vmov 0.0|0.0  }
  0x15   :  { %847 = vmatprep.mubr.msk.f32.mxu1 %vm1038_vm0, %v1037_v0  ;;  %v29_v2 = vld [vmem:[%s1130_s0] sm:$0x3f]  ;;  %839 = vmatpush3.msk.msra.mxu0 %vm41_vm1, %v31_v1  ;;  %v927_v12 = vpack.c.bf16 %v139_v10, %v138_v9  ;;  %v220_v13 = vld [vmem:[#allocation2 + $0x18] sm:$0xff]  ;;  %v222_v15 = vld [vmem:[#allocation2 + $0x28] sm:$0xff]  ;;  %vm145_vm4 = vcmask 130048   ;;  %vm228_vm5 = vcmask 523264  }
  0x16   :  { %841 = vmatmul.mubr.msk.f32.vlgmr.msra.gmra.mrb[0].mxu0 %vm37_vm2, %v29_v2  ;;  %v775_v3 = vld [vmem:[#allocation2 + $0x100] ss:$0 sm:$0xff]  ;;  %926 = vmatprep.subr.bf16.mxu1 %v1039_v11  ;;  %v223_v17 = vld [vmem:[#allocation2 + $0x30] sm:$0xff]  ;;  %v224_v19 = vld [vmem:[#allocation2 + $0x38] sm:$0xff]  ;;  %vm408_vm6 = vcmask 261120   ;;  %vm520_vm7 = vcmask 1045504  }
  0x17   :  { %866 = vmatprep.mubr.msk.f32.mxu0 %vm1038_vm0, %v1037_v0  ;;  %929 = vmatprep.subr.bf16.mxu0 %v1039_v11  ;;  %v221_v14 = vld [vmem:[#allocation2 + $0x20] sm:$0xff]  ;;  %v933_v18 = vpack.c.bf16 %v223_v17, %v222_v15  ;;  %v778_v26 = vld [vmem:[#allocation2 + $0x108] ss:$0 sm:$0xff]  ;;  %v779_v28 = vld [vmem:[#allocation2 + $0x110] ss:$0 sm:$0xff]  ;;  %vm516_vm8 = vcmask 48128  }
  0x18   :  { %928 = vmatpush3.bf16.msra.mxu1 %v927_v12  ;;  %v930_v16 = vpack.c.bf16 %v221_v14, %v220_v13  ;;  %v225_v20 = vld [vmem:[#allocation2 + $0x40] sm:$0xff]  ;;  %v226_v32 = vld [vmem:[#allocation2 + $0x48] sm:$0xff]  ;;  %v227_v33 = vld [vmem:[#allocation2 + $0x50] sm:$0xff] }
  0x19   :  { %941 = vmatprep.subr.bf16.mxu1 %v1039_v11  ;;  %v936_v21 = vpack.c.bf16 %v225_v20, %v224_v19  ;;  %v939_v34 = vpack.c.bf16 %v227_v33, %v226_v32  ;;  %v780_v35 = vld [vmem:[#allocation2 + $0x118] ss:$0 sm:$0xff]  ;;  %v318_v41 = vld [vmem:[#allocation2 + $0x60] sm:$0xff]  ;;  %v319_v43 = vld [vmem:[#allocation2 + $0x68] sm:$0xff] }
  0x1a   :  { %931 = vmatpush3.bf16.msra.mxu0 %v930_v16  ;;  %v317_v40 = vld [vmem:[#allocation2 + $0x58] sm:$0xff]  ;;  %v320_v44 = vld [vmem:[#allocation2 + $0x70] sm:$0xff]  ;;  %v322_v47 = vld [vmem:[#allocation2 + $0x80] sm:$0xff] }
  0x1b   :  { %932 = vmatprep.subr.bf16.mxu0 %v1039_v11  ;;  %v942_v42 = vpack.c.bf16 %v318_v41, %v317_v40  ;;  %v945_v45 = vpack.c.bf16 %v320_v44, %v319_v43  ;;  %v321_v46 = vld [vmem:[#allocation2 + $0x78] sm:$0xff]  ;;  %v323_v49 = vld [vmem:[#allocation2 + $0x88] sm:$0xff]  ;;  %v324_v50 = vld [vmem:[#allocation2 + $0x90] sm:$0xff] }
  0x1c   :  { %v948_v48 = vpack.c.bf16 %v322_v47, %v321_v46  ;;  %v951_v51 = vpack.c.bf16 %v324_v50, %v323_v49  ;;  %v404_v52 = vld [vmem:[#allocation2 + $0x98] sm:$0xff]  ;;  %v405_v53 = vld [vmem:[#allocation2 + $0xa0] sm:$0xff]  ;;  %v784_v61 = vld [vmem:[#allocation2 + $0x128] ss:$0 sm:$0xff] }
  0x1d   :  { %v954_v54 = vpack.c.bf16 %v405_v53, %v404_v52  ;;  %v783_v59 = vld [vmem:[#allocation2 + $0x120] ss:$0 sm:$0xff]  ;;  %v406_v2 = vld [vmem:[#allocation2 + $0xa8] sm:$0xff]  ;;  %v790_v16 = vld [vmem:[#allocation2 + $0x150] ss:$0 sm:$0xff] }
  0x1e   :  { %934 = vmatpush3.bf16.msra.mxu0 %v933_v18  ;;  %v788_v19 = vld [vmem:[#allocation2 + $0x138] ss:$0 sm:$0xff]  ;;  %v596_v33 = vld [vmem:[#allocation2 + $0xd0] sm:$0xff] }
  0x1f   :  { %935 = vmatprep.subr.bf16.mxu0 %v1039_v11  ;;  %v679_v41 = vld [vmem:[#allocation2 + $0xf0] sm:$0xff]  ;;  %v794_v44 = vld [vmem:[#allocation2 + $0x158] ss:$0 sm:$0xff] }
  0x22   :  { %937 = vmatpush3.bf16.msra.mxu0 %v936_v21 }
  0x23   :  { %938 = vmatprep.subr.bf16.mxu0 %v1039_v11 }
  0x26   :  { %940 = vmatpush3.bf16.msra.mxu0 %v939_v34  ;;  %v597_v34 = vld [vmem:[#allocation2 + $0xd8] sm:$0xff] }
  0x27   :  { %953 = vmatprep.subr.bf16.mxu0 %v1039_v11 }
  0xe9   :  { %v111_v4 = vpop.f32.mrb[0].mxu0 }
  0xea   :  { %v112_v5 = vadd.f32 %v775_v3, %v111_v4  ;;  %v842_v6 = vpop.f32.mrb[1].mxu0  ;;  %v407_v3 = vld [vmem:[#allocation2 + $0xb0] sm:$0xff] }
  0xeb   :  { %v957_v4 = vpack.c.bf16 %v407_v3, %v406_v2  ;;  %v1040_v6 = vmov 0  }
  0xec   :  { %v115_v7 = vmul.f32 %v112_v5, %v112_v5  ;;  %979 = vset.pattern.permute.xlu0 %v1040_v6 }
  0xee   :  { %v117_v8 = vsel %vm116_vm3, %v115_v7, 0.0  ;;  %v785_v7 = vld [vmem:[#allocation2 + $0x130] ss:$0 sm:$0xff] }
  0xef   :  { %118 = vadd.xlane.f32.xlu0 %v117_v8 }
 0x17c   :  { %v119_v22 = vpop.xlane.xlu0 %118 }
 0x17d   :  { %v121_v23 = vmul.f32 0.0625, %v119_v22  ;;  %v789_v22 = vld [vmem:[#allocation2 + $0x140] ss:$0 sm:$0xff] }
 0x17f   :  { %v122_v24 = vadd.f32 1e-05, %v121_v23  ;;  %v791_v23 = vld [vmem:[#allocation2 + $0x148] ss:$0 sm:$0xff] }
 0x181   :  { %980 = vrsqrt.f32 %v122_v24 }
 0x18b   :  { %v981_v25 = vpop.eup %980 }
 0x18c   :  { %v124_v27 = vmul.f32 %v981_v25, %v112_v5  ;;  %v30_v5 = vld [vmem:[%s1131_s1] sm:$0x3f]  ;;  %s1041_s1 = smov [#allocation5]  }
 0x18d   :  { %501 = vperm.xlu0 %979, %v30_v5   ;;  %s766_s28 = sshll.u32 %s1041_s1, 4  ;;  %s767_s28 = int_to_ptr.vmem [resolvable:$true] %s766_s28 }
 0x18e   :  { %v130_v29 = vmul.f32 %v778_v26, %v124_v27  ;;  %v594_v27 = vld [vmem:[#allocation2 + $0xc0] sm:$0xff]  ;;  %s1008_s29 = scalar_lea.vmem %s767_s28, 32  ;;  %p1013_p9 = scmp.lt.s32.totalorder %s767_s28, %s767_s28 }
 0x18f   :  { %p1009_p8 = scmp.ne.s32.totalorder %s767_s28, %s1008_s29  ;;  %p1014_p10 = scmp.lt.s32.totalorder %s1008_s29, %s1008_s29 }
 0x190   :  { %v136_v30 = vadd.f32 %v779_v28, %v130_v29  ;;  %v595_v28 = vld [vmem:[#allocation2 + $0xc8] sm:$0xff] }
 0x191   :  { %v960_v32 = vpack.c.bf16 %v595_v28, %v594_v27  ;;  %p1015_p11 = por %p1014_p10, %p1013_p9 }
 0x192   :  { %v137_v31 = vmax.f32 %v136_v30, 0.0 }
 0x193   :  { %p1016_p12 = pnand %p1015_p11, %p1009_p8 }
 0x194   :  { %848 = vmatmul.mubr.msk.f32.vlgmr.msra.gmra.mrb[0].mxu1 %vm145_vm4, %v137_v31  ;;  %v514_v31 = vld [vmem:[#allocation2 + $0xb8] sm:$0x3] }
 0x195   :  { %885 = vmatprep.mubr.msk.f32.mxu1 %vm1038_vm0, %v1037_v0  ;;  %943 = vmatpush3.bf16.msra.mxu1 %v942_v42  ;;  %v680_v42 = vld [vmem:[#allocation2 + $0xf8] sm:$0xff] }
 0x196   :  { %944 = vmatprep.subr.bf16.mxu1 %v1039_v11  ;;  %v969_v43 = vpack.c.bf16 %v680_v42, %v679_v41 }
 0x199   :  { %946 = vmatpush3.bf16.msra.mxu1 %v945_v45 }
 0x19a   :  { %947 = vmatprep.subr.bf16.mxu1 %v1039_v11 }
 0x19d   :  { %949 = vmatpush3.bf16.msra.mxu1 %v948_v48  ;;  %v796_v48 = vld [vmem:[#allocation2 + $0x160] ss:$0 sm:$0xff] }
 0x19e   :  { %950 = vmatprep.subr.bf16.mxu1 %v1039_v11 }
 0x1a1   :  { %952 = vmatpush3.bf16.msra.mxu1 %v951_v51 }
 0x1a2   :  { %899 = vmatprep.subr.mxu1 %v1037_v0 }
 0x20c   :  { %v502_v17 = vpop.permute.xlu0 %501 }
 0x20d   :  { %v508_v21 = vmul.f32 %v790_v16, %v502_v17 }
 0x20f   :  { %v513_v26 = vadd.f32 %v791_v23, %v508_v21 }
 0x267   :  { %v215_v36 = vpop.f32.mrb[0].mxu1 }
 0x268   :  { %v216_v37 = vadd.f32 %v780_v35, %v215_v36  ;;  %v849_v38 = vpop.f32.mrb[1].mxu1  ;;  %v963_v35 = vpack.c.bf16 %v597_v34, %v596_v33  ;;  %v677_v36 = vld [vmem:[#allocation2 + $0xe0] sm:$0xff] }
 0x26a   :  { %v219_v39 = vmul.f32 %v216_v37, %v216_v37 }
 0x26c   :  { %867 = vmatmul.mubr.msk.f32.vlgmr.msra.gmra.mrb[2].mxu0 %vm228_vm5, %v219_v39 }
 0x26d   :  { %896 = vmatprep.mubr.msk.f32.mxu0 %vm1038_vm0, %v1037_v0  ;;  %955 = vmatpush3.bf16.msra.mxu0 %v954_v54 }
 0x26e   :  { %956 = vmatprep.subr.bf16.mxu0 %v1039_v11 }
 0x271   :  { %958 = vmatpush3.bf16.msra.mxu0 %v957_v4 }
 0x272   :  { %965 = vmatprep.subr.bf16.mxu0 %v1039_v11 }
 0x33f   :  { %v298_v55 = vpop.f32.mrb[2].mxu0 }
 0x340   :  { %v299_v56 = vadd.f32 1e-05, %v298_v55  ;;  %v868_v57 = vpop.f32.mrb[3].mxu0 }
 0x342   :  { %982 = vrsqrt.f32 %v299_v56 }
 0x34c   :  { %v983_v58 = vpop.eup %982 }
 0x34d   :  { %v303_v60 = vmul.f32 %v983_v58, %v216_v37  ;;  %v678_v37 = vld [vmem:[#allocation2 + $0xe8] sm:$0xff] }
 0x34e   :  { %v966_v38 = vpack.c.bf16 %v678_v37, %v677_v36 }
 0x34f   :  { %v309_v62 = vmul.f32 %v783_v59, %v303_v60 }
 0x351   :  { %v315_v63 = vadd.f32 %v784_v61, %v309_v62 }
 0x353   :  { %v316_v1 = vmax.f32 %v315_v63, 0.0 }
 0x355   :  { %886 = vmatmul.mubr.msk.f32.vlgmr.msra.gmra.mrb[2].mxu1 %vm228_vm5, %v316_v1 }
 0x356   :  { %901 = vmatprep.mubr.msk.f32.mxu1 %vm1038_vm0, %v1037_v0 }
 0x428   :  { %v399_v8 = vpop.f32.mrb[2].mxu1 }
 0x429   :  { %v400_v9 = vadd.f32 %v785_v7, %v399_v8  ;;  %v887_v10 = vpop.f32.mrb[3].mxu1 }
 0x42b   :  { %v403_v12 = vmul.f32 %v400_v9, %v400_v9 }
 0x42d   :  { %897 = vmatmul.mubr.msk.f32.vlgmr.msra.gmra.mrb[4].mxu0 %vm408_vm6, %v403_v12 }
 0x42e   :  { %923 = vmatprep.mubr.msk.f32.mxu0 %vm1038_vm0, %v1037_v0  ;;  %967 = vmatpush3.bf16.msra.mxu0 %v966_v38 }
 0x42f   :  { %968 = vmatprep.subr.bf16.mxu0 %v1039_v11 }
 0x432   :  { %970 = vmatpush3.bf16.msra.mxu0 %v969_v43 }
 0x500   :  { %v478_v13 = vpop.f32.mrb[4].mxu0 }
 0x501   :  { %v479_v14 = vadd.f32 1e-05, %v478_v13  ;;  %v898_v15 = vpop.f32.mrb[5].mxu0 }
 0x503   :  { %984 = vrsqrt.f32 %v479_v14 }
 0x50d   :  { %v985_v18 = vpop.eup %984 }
 0x50e   :  { %v483_v20 = vmul.f32 %v985_v18, %v400_v9 }
 0x510   :  { %v489_v24 = vmul.f32 %v788_v19, %v483_v20 }
 0x512   :  { %v495_v25 = vadd.f32 %v789_v22, %v489_v24 }
 0x514   :  { %v496_v29 = vmax.f32 %v495_v25, 0.0 }
 0x516   :  { %v515_v30 = vmul.f32 %v513_v26, %v496_v29 }
 0x518   :  { %900 = vmatpush3.msk.msra.mxu1 %vm520_vm7, %v515_v30 }
 0x519   :  { %902 = vmatmul.mubr.msk.f32.vlgmr.msra.gmra.mrb[4].mxu1 %vm516_vm8, %v514_v31  ;;  %959 = vmatprep.subr.bf16.mxu1 %v1039_v11 }
 0x51a   :  { %961 = vmatpush3.bf16.msra.mxu1 %v960_v32  ;;  %912 = vmatprep.mubr.msk.f32.mxu1 %vm1038_vm0, %v1037_v0 }
 0x51b   :  { %962 = vmatprep.subr.bf16.mxu1 %v1039_v11 }
 0x51e   :  { %964 = vmatpush3.bf16.msra.mxu1 %v963_v35 }
 0x5ec   :  { %v590_v39 = vpop.f32.mrb[4].mxu1 }
 0x5ed   :  { %v903_v40 = vpop.f32.mrb[5].mxu1  ;;  %913 = vmatmul.mubr.msk.f32.vlgmr.msra.gmra.mrb[6].mxu1 %vm408_vm6, %v590_v39 }
 0x6c0   :  { %v672_v45 = vpop.f32.mrb[6].mxu1 }
 0x6c1   :  { %v673_v0 = vadd.f32 %v794_v44, %v672_v45  ;;  %v914_v46 = vpop.f32.mrb[7].mxu1 }
 0x6c3   :  { %v676_v47 = vmax.f32 %v673_v0, 0.0 }
 0x6c5   :  { %924 = vmatmul.mubr.msk.f32.vlgmr.msra.gmra.mrb[6].mxu0 %vm408_vm6, %v676_v47 }
 0x798   :  { %v755_v49 = vpop.f32.mrb[6].mxu0 }
 0x799   :  { %v756_v11 = vadd.f32 %v796_v48, %v755_v49  ;;  %v925_v50 = vpop.f32.mrb[7].mxu0 }
 0x79b   :  { %759 = vst [vmem:[#allocation5] sm:$0x3] %v756_v11 }
 0x79c   :  { %1019 = shalt.err (!%p1016_p12)
}
 0x79d   :  { %s1020_s5 = scalar_lea.hbm %s1133_s3, 32 }
 0x79e   :  { %p1021_p13 = scmp.ne.s32.totalorder %s1133_s3, %s1020_s5  ;;  %p1024_p0 = scmp.lt.u32.totalorder %s1020_s5, %s1133_s3 }
 0x7a0   :  { %p1026_p1 = pnand %p1024_p0, %p1021_p13 }
 0x7a2   :  { %1029 = shalt.err (!%p1026_p1)
}
 0x7a3   :  { %769 = dma.vmem_to_hbm [thread:$0]  %s767_s28, 32, %s1133_s3, [#allocation4]  }
 0x7a4   :  { %1032 = dma.done.wait [#allocation4], 32  }
 0x7a5   :  { %1033 = vsyncadd [#allocation4], 4294967264 }
 0x7a6   :  { %773 = vsyncpa [#allocation3], 1 }
 0x7a7   :  { %774 = vsyncpa [#allocation4], 1 }

</bundles_post_ra>
